<compile_context>
chip_gen: v5e
topology: v5e:2x2
jax: 0.10.0
libtpu: 0.0.40
codegen_flags: <defaults>
</compile_context>

<pallas_src>
import functools

import jax
import jax.numpy as jnp
import numpy as np
from jax.experimental import pallas as pl
from jax.experimental.pallas import tpu as pltpu


def _vmem_capacity_bytes():
    """Per-TensorCore VMEM capacity; conservative 64 MiB (v7x) if unknown."""
    try:
        info = pltpu.get_tpu_info()
        cap = getattr(info, "vmem_capacity_bytes", None)
        if cap:
            return int(cap)
    except Exception:
        pass
    return 64 << 20


# ---------------------------------------------------------------------------
# Shared gate: sigmoid(conv3x3([max_plane, avg_plane])) on the flattened H*W
# lane axis.  A (di, dj) tap is a flat shift of di*W + dj; the row zero padding
# comes from VMEM scratch planes whose `pad`-lane halos are kept at zero, and
# the column wrap is removed with two precomputed float edge masks.
# ---------------------------------------------------------------------------
def _gate_from_planes(w_ref, mx, av, pm_scr, pa_scr, *, width, pad):
    rows, hw = mx.shape

    # Zero only the halo regions (2*pad lanes per row; cheap).  Re-zeroed every
    # step because a megacore-sharded "parallel" axis has no safe
    # "first step on this core" predicate for a one-time init.
    halo = jnp.zeros((rows, pad), jnp.float32)
    pm_scr[:, 0:pad] = halo
    pm_scr[:, pad + hw:pad + hw + pad] = halo
    pa_scr[:, 0:pad] = halo
    pa_scr[:, pad + hw:pad + hw + pad] = halo
    # Lane-aligned data-region writes (pad is a multiple of 128).
    pm_scr[:, pad:pad + hw] = mx
    pa_scr[:, pad:pad + hw] = av

    def tap(ref, s):  # out[n] = plane[n + s], zero outside the image rows
        return ref[:, pad + s:pad + s + hw]

    left = jnp.zeros((rows, hw), jnp.float32)    # dj = -1 taps
    center = jnp.zeros((rows, hw), jnp.float32)  # dj =  0 taps
    right = jnp.zeros((rows, hw), jnp.float32)   # dj = +1 taps
    for di in (-1, 0, 1):
        kh = di + 1
        s = di * width
        left = (left
                + w_ref[kh * 3 + 0] * tap(pm_scr, s - 1)
                + w_ref[9 + kh * 3 + 0] * tap(pa_scr, s - 1))
        center = (center
                  + w_ref[kh * 3 + 1] * tap(pm_scr, s)
                  + w_ref[9 + kh * 3 + 1] * tap(pa_scr, s))
        right = (right
                 + w_ref[kh * 3 + 2] * tap(pm_scr, s + 1)
                 + w_ref[9 + kh * 3 + 2] * tap(pa_scr, s + 1))

    # Column-edge masks, built once per call and applied as float multiplies.
    col = jax.lax.broadcasted_iota(jnp.int32, (1, hw), 1) % width
    lmask = (col != 0).astype(jnp.float32)
    rmask = (col != width - 1).astype(jnp.float32)
    acc = center + left * lmask + right * rmask

    # Sigmoid.  approx=True reciprocal would push the divide to the EUP vrcp but
    # its error exceeds the 1e-5 check tolerance; keep the exact reciprocal.
    return pl.reciprocal(1.0 + jnp.exp(-acc), approx=False)


# ---------------------------------------------------------------------------
# Monolithic path: one (bb, C, H*W) block per grid step.
# ---------------------------------------------------------------------------
def _spatial_block_kernel(w_ref, x_ref, o_ref, pm_scr, pa_scr, *, width, pad):
    x = x_ref[...]                                         # native dtype block
    c = x.shape[1]
    mx = jnp.max(x, axis=1).astype(jnp.float32)            # (bb, HW)
    av = jnp.sum(x, axis=1, dtype=jnp.float32) * (1.0 / c)
    sig = _gate_from_planes(w_ref, mx, av, pm_scr, pa_scr, width=width, pad=pad)
    # Scale: gate cast down to the I/O dtype times the re-read native block;
    # no long-lived f32 copy of x.
    o_ref[...] = (sig.astype(o_ref.dtype)[:, None, :] * x_ref[...]).astype(o_ref.dtype)


# ---------------------------------------------------------------------------
# H-tiled two-pass path (large C*H*W that cannot fit a whole image in VMEM).
# ---------------------------------------------------------------------------
def _reduce_kernel(x_ref, p_ref):
    """Pass 1: per-(batch, H-tile) channel max / f32-accumulated mean planes."""
    x = x_ref[...]                                         # (1, C, th*W) native
    c = x.shape[1]
    p_ref[:, 0:1, :] = jnp.max(x, axis=1).astype(jnp.float32)[:, None, :]
    p_ref[:, 1:2, :] = (jnp.sum(x, axis=1, dtype=jnp.float32) * (1.0 / c))[:, None, :]


def _gate_scale_kernel(w_ref, p_ref, x_ref, o_ref, pm_scr, pa_scr, gate_scr, *,
                       width, pad, th):
    """Pass 2: full-image gate once per batch (h == 0), then scale the H tile."""
    hi = pl.program_id(1)
    tw = th * width

    @pl.when(hi == 0)
    def _():
        planes = p_ref[...]                                # (1, 2, HW) f32
        gate_scr[...] = _gate_from_planes(
            w_ref, planes[:, 0, :], planes[:, 1, :], pm_scr, pa_scr,
            width=width, pad=pad)

    start = hi * tw
    if tw % 128 == 0:
        start = pl.multiple_of(start, 128)
    g = gate_scr[:, pl.ds(start, tw)]                      # (1, tw) f32
    o_ref[...] = (g.astype(o_ref.dtype)[:, None, :] * x_ref[...]).astype(o_ref.dtype)


# ---------------------------------------------------------------------------
# Wrapper
# ---------------------------------------------------------------------------
def spatial_forward(x, conv_weight, *, batch_block=None, force_htiled=False,
                    h_block=None):
    """x: (B, C, H, W); conv_weight: (1, 2, 3, 3). Returns (B, C, H, W), x.dtype."""
    B, C, H, W = x.shape
    HW = H * W
    itemsize = np.dtype(x.dtype).itemsize
    x_flat = x.reshape(B, C, HW)                           # lane axis = H*W
    w_flat = conv_weight.reshape(-1).astype(jnp.float32)   # (18,) [c, kh, kw]

    pad = ((W + 1 + 127) // 128) * 128                     # lane-aligned halo
    plen = HW + 2 * pad
    per_img = C * HW * itemsize

    cap = _vmem_capacity_bytes()
    usable = max(cap - (8 << 20), 16 << 20)                # ~8 MiB headroom

    def mono_need(bb_):
        blk = bb_ * per_img
        return int(6 * blk + 2 * bb_ * plen * 4 + 12 * bb_ * HW * 4 + (4 << 20))

    def p2_need(th_):
        blk = C * th_ * W * itemsize
        return int(5 * blk + 2 * (2 * HW * 4) + (2 * plen + HW) * 4
                   + 10 * HW * 4 + 8 * th_ * W * 4 + (4 << 20))

    use_htiled = bool(force_htiled)
    bb = 1
    if not use_htiled:
        if batch_block is not None:
            bb = int(batch_block)
        else:
            divs = [d for d in range(1, B + 1) if B % d == 0]
            target = 4 << 20                               # ~4 MiB per-step blocks
            cands = [d for d in divs
                     if mono_need(d) <= usable and (B < 2 or d <= B // 2)]
            if cands:
                # Prefer blocks under the target, an even number of grid steps
                # (v7x megacore), then the largest batch fold.
                bb = max(cands, key=lambda d: (d * per_img <= target,
                                               (B // d) % 2 == 0, d))
            else:
                use_htiled = True                          # one image > VMEM budget

    th = None
    if use_htiled:
        if h_block is not None:
            th = int(h_block)
        else:
            ths = [t for t in range(1, H + 1) if H % t == 0
                   and (t == H or (t * W) % 128 == 0) and p2_need(t) <= usable]
            if ths:
                under = [t for t in ths if C * t * W * itemsize <= (16 << 20)]
                th = max(under) if under else min(ths)
            else:
                # TODO(synk): no lane-aligned H tile fits the VMEM budget (e.g.
                # a single enormous row); fall back to the monolithic path.
                use_htiled = False
                bb = 1
        if th is not None:
            assert H % th == 0 and (th == H or (th * W) % 128 == 0), (
                "h_block must divide H and give a 128-multiple lane width")

    if not use_htiled:
        grid = (B // bb,)
        vmem_limit = int(min(usable, max(32 << 20, mono_need(bb))))
        kernel = functools.partial(_spatial_block_kernel, width=W, pad=pad)
        out_flat = pl.pallas_call(
            kernel,
            out_shape=jax.ShapeDtypeStruct((B, C, HW), x.dtype),
            grid_spec=pltpu.PrefetchScalarGridSpec(
                num_scalar_prefetch=0,
                grid=grid,
                in_specs=[
                    # TODO(synk): could be a num_scalar_prefetch operand; kept as
                    # a plain SMEM input (proven path, negligible bytes).
                    pl.BlockSpec(memory_space=pltpu.SMEM),             # conv weights
                    pl.BlockSpec((bb, C, HW), lambda b: (b, 0, 0)),    # x block
                ],
                out_specs=pl.BlockSpec((bb, C, HW), lambda b: (b, 0, 0)),
                scratch_shapes=[
                    pltpu.VMEM((bb, plen), jnp.float32),   # padded max plane
                    pltpu.VMEM((bb, plen), jnp.float32),   # padded avg plane
                ],
            ),
            compiler_params=pltpu.CompilerParams(
                dimension_semantics=("parallel",),
                vmem_limit_bytes=vmem_limit),
        )(w_flat, x_flat)
        return out_flat.reshape(B, C, H, W)

    # ------------------------- H-tiled two-pass path -------------------------
    thW = th * W
    n_h = H // th
    blk1 = C * thW * itemsize

    vmem1 = int(min(usable, max(32 << 20, 4 * blk1 + 8 * thW * 4 + (4 << 20))))
    planes = pl.pallas_call(
        _reduce_kernel,
        out_shape=jax.ShapeDtypeStruct((B, 2, HW), jnp.float32),
        grid_spec=pltpu.PrefetchScalarGridSpec(
            num_scalar_prefetch=0,
            grid=(B, n_h),
            in_specs=[pl.BlockSpec((1, C, thW), lambda b, h: (b, 0, h))],
            out_specs=pl.BlockSpec((1, 2, thW), lambda b, h: (b, 0, h)),
        ),
        compiler_params=pltpu.CompilerParams(
            dimension_semantics=("parallel", "parallel"),
            vmem_limit_bytes=vmem1),
    )(x_flat)

    vmem2 = int(min(usable, max(32 << 20, p2_need(th))))
    kernel2 = functools.partial(_gate_scale_kernel, width=W, pad=pad, th=th)
    out_flat = pl.pallas_call(
        kernel2,
        out_shape=jax.ShapeDtypeStruct((B, C, HW), x.dtype),
        grid_spec=pltpu.PrefetchScalarGridSpec(
            num_scalar_prefetch=0,
            grid=(B, n_h),
            in_specs=[
                pl.BlockSpec(memory_space=pltpu.SMEM),                 # conv weights
                pl.BlockSpec((1, 2, HW), lambda b, h: (b, 0, 0)),      # planes (resident / batch)
                pl.BlockSpec((1, C, thW), lambda b, h: (b, 0, h)),     # x tile
            ],
            out_specs=pl.BlockSpec((1, C, thW), lambda b, h: (b, 0, h)),
            scratch_shapes=[
                pltpu.VMEM((1, plen), jnp.float32),                    # padded max plane
                pltpu.VMEM((1, plen), jnp.float32),                    # padded avg plane
                pltpu.VMEM((1, HW), jnp.float32),                      # full-image gate
            ],
        ),
        compiler_params=pltpu.CompilerParams(
            dimension_semantics=("parallel", "arbitrary"),
            vmem_limit_bytes=vmem2),
    )(w_flat, planes, x_flat)
    return out_flat.reshape(B, C, H, W)


def _reference_forward(x, conv_weight):
    # Pure-JAX reference mirroring the PyTorch forward exactly.
    mx = jnp.max(x, axis=1, keepdims=True)
    av = jnp.mean(x, axis=1, keepdims=True)
    cat = jnp.concatenate([mx, av], axis=1)                # (B, 2, H, W)
    out = jax.lax.conv_general_dilated(
        cat, conv_weight, window_strides=(1, 1), padding="SAME",
        dimension_numbers=("NCHW", "OIHW", "NCHW"),
        precision=jax.lax.Precision.HIGHEST)
    return jax.nn.sigmoid(out) * x


if __name__ == "__main__":
    key = jax.random.PRNGKey(0)
    kx, kw = jax.random.split(key)

    B, C, H, W = 2, 4, 16, 16
    x = jax.random.normal(kx, (B, C, H, W), dtype=jnp.float32)

    # Deterministic conv weight init (Conv2d(2 -> 1, k=3, bias=False)):
    # kaiming-uniform-like bound = 1/sqrt(fan_in), fan_in = 2*3*3 = 18.
    bound = 1.0 / np.sqrt(2 * 3 * 3)
    conv_weight = jax.random.uniform(
        kw, (1, 2, 3, 3), jnp.float32, -bound, bound)

    ref = jax.block_until_ready(_reference_forward(x, conv_weight))

    # Main (monolithic) path: grid has 2 steps (bb <= B//2).
    out = jax.block_until_ready(spatial_forward(x, conv_weight))
    np.testing.assert_allclose(np.asarray(out), np.asarray(ref),
                               rtol=1e-5, atol=1e-5)

    # Exercise the H-tiled two-pass fallback (used when one image > VMEM budget).
    out_t = jax.block_until_ready(
        spatial_forward(x, conv_weight, force_htiled=True, h_block=8))
    np.testing.assert_allclose(np.asarray(out_t), np.asarray(ref),
                               rtol=1e-5, atol=1e-5)

    print("KERNEL_OK")
</pallas_src>

<mosaic_0001>
module attributes {stable_mosaic.version = 11 : i64} {
  func.func @_spatial_block_kernel(%arg0: i32, %arg1: memref<18xf32, #tpu.memory_space<smem>>, %arg2: memref<1x4x256xf32, #tpu.memory_space<vmem>>, %arg3: memref<1x4x256xf32, #tpu.memory_space<vmem>>, %arg4: memref<1x512xf32, #tpu.memory_space<vmem>>, %arg5: memref<1x512xf32, #tpu.memory_space<vmem>>) attributes {dimension_semantics = [#tpu.dimension_semantics<parallel>], iteration_bounds = array<i64: 2>, scalar_prefetch = 0 : i64, scratch_operands = 2 : i64, tpu.core_type = #tpu.core_type<tc>, window_params = [{transform_indices = @transform_0, window_bounds = array<i64: 18>}, {transform_indices = @transform_1, window_bounds = array<i64: 1, 4, 256>}, {transform_indices = @transform_2, window_bounds = array<i64: 1, 4, 256>}]} {
    %c0 = arith.constant 0 : index
    %c0_0 = arith.constant 0 : index
    %c0_1 = arith.constant 0 : index
    %0 = vector.load %arg2[%c0, %c0_0, %c0_1] : memref<1x4x256xf32, #tpu.memory_space<vmem>>, vector<1x4x256xf32>
    %cst = arith.constant dense<0xFF800000> : vector<1x256xf32>
    %1 = vector.multi_reduction <maximumf>, %0, %cst [1] : vector<1x4x256xf32> to vector<1x256xf32>
    %cst_2 = arith.constant dense<0.000000e+00> : vector<1x256xf32>
    %2 = vector.multi_reduction <add>, %0, %cst_2 [1] : vector<1x4x256xf32> to vector<1x256xf32>
    %cst_3 = arith.constant 2.500000e-01 : f32
    %3 = vector.broadcast %cst_3 : f32 to vector<1x256xf32>
    %4 = arith.mulf %2, %3 : vector<1x256xf32>
    %cst_4 = arith.constant 0.000000e+00 : f32
    %5 = vector.broadcast %cst_4 : f32 to vector<1x128xf32>
    %c0_5 = arith.constant 0 : index
    %c0_6 = arith.constant 0 : index
    %6 = vector.load %arg4[%c0_5, %c0_6] : memref<1x512xf32, #tpu.memory_space<vmem>>, vector<1x128xf32>
    tpu.vector_store %arg4[%c0_5, %c0_6], %5 {strides = array<i32>} : memref<1x512xf32, #tpu.memory_space<vmem>>, vector<1x128xf32>,
    %c0_7 = arith.constant 0 : index
    %c384 = arith.constant 384 : index
    %7 = vector.load %arg4[%c0_7, %c384] : memref<1x512xf32, #tpu.memory_space<vmem>>, vector<1x128xf32>
    tpu.vector_store %arg4[%c0_7, %c384], %5 {strides = array<i32>} : memref<1x512xf32, #tpu.memory_space<vmem>>, vector<1x128xf32>,
    %c0_8 = arith.constant 0 : index
    %c0_9 = arith.constant 0 : index
    %8 = vector.load %arg5[%c0_8, %c0_9] : memref<1x512xf32, #tpu.memory_space<vmem>>, vector<1x128xf32>
    tpu.vector_store %arg5[%c0_8, %c0_9], %5 {strides = array<i32>} : memref<1x512xf32, #tpu.memory_space<vmem>>, vector<1x128xf32>,
    %c0_10 = arith.constant 0 : index
    %c384_11 = arith.constant 384 : index
    %9 = vector.load %arg5[%c0_10, %c384_11] : memref<1x512xf32, #tpu.memory_space<vmem>>, vector<1x128xf32>
    tpu.vector_store %arg5[%c0_10, %c384_11], %5 {strides = array<i32>} : memref<1x512xf32, #tpu.memory_space<vmem>>, vector<1x128xf32>,
    %c0_12 = arith.constant 0 : index
    %c128 = arith.constant 128 : index
    %10 = vector.load %arg4[%c0_12, %c128] : memref<1x512xf32, #tpu.memory_space<vmem>>, vector<1x256xf32>
    tpu.vector_store %arg4[%c0_12, %c128], %1 {strides = array<i32>} : memref<1x512xf32, #tpu.memory_space<vmem>>, vector<1x256xf32>,
    %c0_13 = arith.constant 0 : index
    %c128_14 = arith.constant 128 : index
    %11 = vector.load %arg5[%c0_13, %c128_14] : memref<1x512xf32, #tpu.memory_space<vmem>>, vector<1x256xf32>
    tpu.vector_store %arg5[%c0_13, %c128_14], %4 {strides = array<i32>} : memref<1x512xf32, #tpu.memory_space<vmem>>, vector<1x256xf32>,
    %cst_15 = arith.constant 0.000000e+00 : f32
    %12 = vector.broadcast %cst_15 : f32 to vector<1x256xf32>
    %cst_16 = arith.constant 0.000000e+00 : f32
    %13 = vector.broadcast %cst_16 : f32 to vector<1x256xf32>
    %cst_17 = arith.constant 0.000000e+00 : f32
    %14 = vector.broadcast %cst_17 : f32 to vector<1x256xf32>
    %c0_18 = arith.constant 0 : index
    %15 = memref.load %arg1[%c0_18] : memref<18xf32, #tpu.memory_space<smem>>
    %c0_19 = arith.constant 0 : index
    %c111 = arith.constant 111 : index
    %16 = vector.load %arg4[%c0_19, %c111] : memref<1x512xf32, #tpu.memory_space<vmem>>, vector<1x256xf32>
    %17 = vector.broadcast %15 : f32 to vector<1x256xf32>
    %18 = arith.mulf %17, %16 : vector<1x256xf32>
    %19 = arith.addf %12, %18 : vector<1x256xf32>
    %c9 = arith.constant 9 : index
    %20 = memref.load %arg1[%c9] : memref<18xf32, #tpu.memory_space<smem>>
    %c0_20 = arith.constant 0 : index
    %c111_21 = arith.constant 111 : index
    %21 = vector.load %arg5[%c0_20, %c111_21] : memref<1x512xf32, #tpu.memory_space<vmem>>, vector<1x256xf32>
    %22 = vector.broadcast %20 : f32 to vector<1x256xf32>
    %23 = arith.mulf %22, %21 : vector<1x256xf32>
    %24 = arith.addf %19, %23 : vector<1x256xf32>
    %c1 = arith.constant 1 : index
    %25 = memref.load %arg1[%c1] : memref<18xf32, #tpu.memory_space<smem>>
    %c0_22 = arith.constant 0 : index
    %c112 = arith.constant 112 : index
    %26 = vector.load %arg4[%c0_22, %c112] : memref<1x512xf32, #tpu.memory_space<vmem>>, vector<1x256xf32>
    %27 = vector.broadcast %25 : f32 to vector<1x256xf32>
    %28 = arith.mulf %27, %26 : vector<1x256xf32>
    %29 = arith.addf %13, %28 : vector<1x256xf32>
    %c10 = arith.constant 10 : index
    %30 = memref.load %arg1[%c10] : memref<18xf32, #tpu.memory_space<smem>>
    %c0_23 = arith.constant 0 : index
    %c112_24 = arith.constant 112 : index
    %31 = vector.load %arg5[%c0_23, %c112_24] : memref<1x512xf32, #tpu.memory_space<vmem>>, vector<1x256xf32>
    %32 = vector.broadcast %30 : f32 to vector<1x256xf32>
    %33 = arith.mulf %32, %31 : vector<1x256xf32>
    %34 = arith.addf %29, %33 : vector<1x256xf32>
    %c2 = arith.constant 2 : index
    %35 = memref.load %arg1[%c2] : memref<18xf32, #tpu.memory_space<smem>>
    %c0_25 = arith.constant 0 : index
    %c113 = arith.constant 113 : index
    %36 = vector.load %arg4[%c0_25, %c113] : memref<1x512xf32, #tpu.memory_space<vmem>>, vector<1x256xf32>
    %37 = vector.broadcast %35 : f32 to vector<1x256xf32>
    %38 = arith.mulf %37, %36 : vector<1x256xf32>
    %39 = arith.addf %14, %38 : vector<1x256xf32>
    %c11 = arith.constant 11 : index
    %40 = memref.load %arg1[%c11] : memref<18xf32, #tpu.memory_space<smem>>
    %c0_26 = arith.constant 0 : index
    %c113_27 = arith.constant 113 : index
    %41 = vector.load %arg5[%c0_26, %c113_27] : memref<1x512xf32, #tpu.memory_space<vmem>>, vector<1x256xf32>
    %42 = vector.broadcast %40 : f32 to vector<1x256xf32>
    %43 = arith.mulf %42, %41 : vector<1x256xf32>
    %44 = arith.addf %39, %43 : vector<1x256xf32>
    %c3 = arith.constant 3 : index
    %45 = memref.load %arg1[%c3] : memref<18xf32, #tpu.memory_space<smem>>
    %c0_28 = arith.constant 0 : index
    %c127 = arith.constant 127 : index
    %46 = vector.load %arg4[%c0_28, %c127] : memref<1x512xf32, #tpu.memory_space<vmem>>, vector<1x256xf32>
    %47 = vector.broadcast %45 : f32 to vector<1x256xf32>
    %48 = arith.mulf %47, %46 : vector<1x256xf32>
    %49 = arith.addf %24, %48 : vector<1x256xf32>
    %c12 = arith.constant 12 : index
    %50 = memref.load %arg1[%c12] : memref<18xf32, #tpu.memory_space<smem>>
    %c0_29 = arith.constant 0 : index
    %c127_30 = arith.constant 127 : index
    %51 = vector.load %arg5[%c0_29, %c127_30] : memref<1x512xf32, #tpu.memory_space<vmem>>, vector<1x256xf32>
    %52 = vector.broadcast %50 : f32 to vector<1x256xf32>
    %53 = arith.mulf %52, %51 : vector<1x256xf32>
    %54 = arith.addf %49, %53 : vector<1x256xf32>
    %c4 = arith.constant 4 : index
    %55 = memref.load %arg1[%c4] : memref<18xf32, #tpu.memory_space<smem>>
    %c0_31 = arith.constant 0 : index
    %c128_32 = arith.constant 128 : index
    %56 = vector.load %arg4[%c0_31, %c128_32] : memref<1x512xf32, #tpu.memory_space<vmem>>, vector<1x256xf32>
    %57 = vector.broadcast %55 : f32 to vector<1x256xf32>
    %58 = arith.mulf %57, %56 : vector<1x256xf32>
    %59 = arith.addf %34, %58 : vector<1x256xf32>
    %c13 = arith.constant 13 : index
    %60 = memref.load %arg1[%c13] : memref<18xf32, #tpu.memory_space<smem>>
    %c0_33 = arith.constant 0 : index
    %c128_34 = arith.constant 128 : index
    %61 = vector.load %arg5[%c0_33, %c128_34] : memref<1x512xf32, #tpu.memory_space<vmem>>, vector<1x256xf32>
    %62 = vector.broadcast %60 : f32 to vector<1x256xf32>
    %63 = arith.mulf %62, %61 : vector<1x256xf32>
    %64 = arith.addf %59, %63 : vector<1x256xf32>
    %c5 = arith.constant 5 : index
    %65 = memref.load %arg1[%c5] : memref<18xf32, #tpu.memory_space<smem>>
    %c0_35 = arith.constant 0 : index
    %c129 = arith.constant 129 : index
    %66 = vector.load %arg4[%c0_35, %c129] : memref<1x512xf32, #tpu.memory_space<vmem>>, vector<1x256xf32>
    %67 = vector.broadcast %65 : f32 to vector<1x256xf32>
    %68 = arith.mulf %67, %66 : vector<1x256xf32>
    %69 = arith.addf %44, %68 : vector<1x256xf32>
    %c14 = arith.constant 14 : index
    %70 = memref.load %arg1[%c14] : memref<18xf32, #tpu.memory_space<smem>>
    %c0_36 = arith.constant 0 : index
    %c129_37 = arith.constant 129 : index
    %71 = vector.load %arg5[%c0_36, %c129_37] : memref<1x512xf32, #tpu.memory_space<vmem>>, vector<1x256xf32>
    %72 = vector.broadcast %70 : f32 to vector<1x256xf32>
    %73 = arith.mulf %72, %71 : vector<1x256xf32>
    %74 = arith.addf %69, %73 : vector<1x256xf32>
    %c6 = arith.constant 6 : index
    %75 = memref.load %arg1[%c6] : memref<18xf32, #tpu.memory_space<smem>>
    %c0_38 = arith.constant 0 : index
    %c143 = arith.constant 143 : index
    %76 = vector.load %arg4[%c0_38, %c143] : memref<1x512xf32, #tpu.memory_space<vmem>>, vector<1x256xf32>
    %77 = vector.broadcast %75 : f32 to vector<1x256xf32>
    %78 = arith.mulf %77, %76 : vector<1x256xf32>
    %79 = arith.addf %54, %78 : vector<1x256xf32>
    %c15 = arith.constant 15 : index
    %80 = memref.load %arg1[%c15] : memref<18xf32, #tpu.memory_space<smem>>
    %c0_39 = arith.constant 0 : index
    %c143_40 = arith.constant 143 : index
    %81 = vector.load %arg5[%c0_39, %c143_40] : memref<1x512xf32, #tpu.memory_space<vmem>>, vector<1x256xf32>
    %82 = vector.broadcast %80 : f32 to vector<1x256xf32>
    %83 = arith.mulf %82, %81 : vector<1x256xf32>
    %84 = arith.addf %79, %83 : vector<1x256xf32>
    %c7 = arith.constant 7 : index
    %85 = memref.load %arg1[%c7] : memref<18xf32, #tpu.memory_space<smem>>
    %c0_41 = arith.constant 0 : index
    %c144 = arith.constant 144 : index
    %86 = vector.load %arg4[%c0_41, %c144] : memref<1x512xf32, #tpu.memory_space<vmem>>, vector<1x256xf32>
    %87 = vector.broadcast %85 : f32 to vector<1x256xf32>
    %88 = arith.mulf %87, %86 : vector<1x256xf32>
    %89 = arith.addf %64, %88 : vector<1x256xf32>
    %c16 = arith.constant 16 : index
    %90 = memref.load %arg1[%c16] : memref<18xf32, #tpu.memory_space<smem>>
    %c0_42 = arith.constant 0 : index
    %c144_43 = arith.constant 144 : index
    %91 = vector.load %arg5[%c0_42, %c144_43] : memref<1x512xf32, #tpu.memory_space<vmem>>, vector<1x256xf32>
    %92 = vector.broadcast %90 : f32 to vector<1x256xf32>
    %93 = arith.mulf %92, %91 : vector<1x256xf32>
    %94 = arith.addf %89, %93 : vector<1x256xf32>
    %c8 = arith.constant 8 : index
    %95 = memref.load %arg1[%c8] : memref<18xf32, #tpu.memory_space<smem>>
    %c0_44 = arith.constant 0 : index
    %c145 = arith.constant 145 : index
    %96 = vector.load %arg4[%c0_44, %c145] : memref<1x512xf32, #tpu.memory_space<vmem>>, vector<1x256xf32>
    %97 = vector.broadcast %95 : f32 to vector<1x256xf32>
    %98 = arith.mulf %97, %96 : vector<1x256xf32>
    %99 = arith.addf %74, %98 : vector<1x256xf32>
    %c17 = arith.constant 17 : index
    %100 = memref.load %arg1[%c17] : memref<18xf32, #tpu.memory_space<smem>>
    %c0_45 = arith.constant 0 : index
    %c145_46 = arith.constant 145 : index
    %101 = vector.load %arg5[%c0_45, %c145_46] : memref<1x512xf32, #tpu.memory_space<vmem>>, vector<1x256xf32>
    %102 = vector.broadcast %100 : f32 to vector<1x256xf32>
    %103 = arith.mulf %102, %101 : vector<1x256xf32>
    %104 = arith.addf %99, %103 : vector<1x256xf32>
    %105 = tpu.iota {dimensions = array<i32: 1>} : vector<1x256xi32>
    %c16_i32 = arith.constant 16 : i32
    %c0_i32 = arith.constant 0 : i32
    %106 = arith.cmpi eq, %c16_i32, %c0_i32 : i32
    %c1_i32 = arith.constant 1 : i32
    %107 = arith.select %106, %c1_i32, %c16_i32 : i32
    %108 = vector.broadcast %107 : i32 to vector<1x256xi32>
    %109 = arith.remsi %105, %108 : vector<1x256xi32>
    %c0_i32_47 = arith.constant 0 : i32
    %110 = vector.broadcast %c0_i32_47 : i32 to vector<1x256xi32>
    %111 = arith.cmpi ne, %109, %110 : vector<1x256xi32>
    %c0_i32_48 = arith.constant 0 : i32
    %112 = vector.broadcast %c0_i32_48 : i32 to vector<1x256xi32>
    %113 = arith.cmpi slt, %109, %112 : vector<1x256xi32>
    %c0_i32_49 = arith.constant 0 : i32
    %114 = arith.cmpi slt, %107, %c0_i32_49 : i32
    %115 = vector.broadcast %114 : i1 to vector<1x256xi1>
    %116 = vector.broadcast %115 : vector<1x256xi1> to vector<1x256xi1>
    %117 = arith.xori %113, %116 : vector<1x256xi1>
    %118 = arith.andi %117, %111 : vector<1x256xi1>
    %119 = vector.broadcast %107 : i32 to vector<1x256xi32>
    %120 = arith.addi %109, %119 : vector<1x256xi32>
    %121 = arith.select %118, %120, %109 : vector<1x256xi1>, vector<1x256xi32>
    %c0_i32_50 = arith.constant 0 : i32
    %122 = vector.broadcast %c0_i32_50 : i32 to vector<1x256xi32>
    %123 = arith.cmpi ne, %121, %122 : vector<1x256xi32>
    %124 = arith.extui %123 : vector<1x256xi1> to vector<1x256xi32>
    %125 = arith.sitofp %124 : vector<1x256xi32> to vector<1x256xf32>
    %c15_i32 = arith.constant 15 : i32
    %126 = vector.broadcast %c15_i32 : i32 to vector<1x256xi32>
    %127 = arith.cmpi ne, %121, %126 : vector<1x256xi32>
    %128 = arith.extui %127 : vector<1x256xi1> to vector<1x256xi32>
    %129 = arith.sitofp %128 : vector<1x256xi32> to vector<1x256xf32>
    %130 = arith.mulf %84, %125 : vector<1x256xf32>
    %131 = arith.addf %94, %130 : vector<1x256xf32>
    %132 = arith.mulf %104, %129 : vector<1x256xf32>
    %133 = arith.addf %131, %132 : vector<1x256xf32>
    %cst_51 = arith.constant 0.000000e+00 : f32
    %134 = vector.broadcast %cst_51 : f32 to vector<1x256xf32>
    %135 = arith.subf %134, %133 : vector<1x256xf32>
    %136 = math.exp %135 : vector<1x256xf32>
    %cst_52 = arith.constant 1.000000e+00 : f32
    %137 = vector.broadcast %cst_52 : f32 to vector<1x256xf32>
    %138 = arith.addf %137, %136 : vector<1x256xf32>
    %139 = tpu.reciprocal %138 : vector<1x256xf32> -> vector<1x256xf32>
    %140 = vector.shape_cast %139 : vector<1x256xf32> to vector<1x1x256xf32>
    %c0_53 = arith.constant 0 : index
    %c0_54 = arith.constant 0 : index
    %c0_55 = arith.constant 0 : index
    %141 = vector.load %arg2[%c0_53, %c0_54, %c0_55] : memref<1x4x256xf32, #tpu.memory_space<vmem>>, vector<1x4x256xf32>
    %142 = vector.broadcast %140 : vector<1x1x256xf32> to vector<1x4x256xf32>
    %143 = arith.mulf %142, %141 : vector<1x4x256xf32>
    %c0_56 = arith.constant 0 : index
    %c0_57 = arith.constant 0 : index
    %c0_58 = arith.constant 0 : index
    %144 = vector.load %arg3[%c0_56, %c0_57, %c0_58] : memref<1x4x256xf32, #tpu.memory_space<vmem>>, vector<1x4x256xf32>
    tpu.vector_store %arg3[%c0_56, %c0_57, %c0_58], %143 {strides = array<i32>} : memref<1x4x256xf32, #tpu.memory_space<vmem>>, vector<1x4x256xf32>,
    return
  }
  func.func @transform_0(%arg0: i32) -> i32 {
    %c0_i32 = arith.constant 0 : i32
    %c0_i32_0 = arith.constant 0 : i32
    return %c0_i32 : i32
  }
  func.func @transform_1(%arg0: i32) -> (i32, i32, i32) {
    %c0_i32 = arith.constant 0 : i32
    %c0_i32_0 = arith.constant 0 : i32
    %c0_i32_1 = arith.constant 0 : i32
    return %arg0, %c0_i32, %c0_i32_0 : i32, i32, i32
  }
  func.func @transform_2(%arg0: i32) -> (i32, i32, i32) {
    %c0_i32 = arith.constant 0 : i32
    %c0_i32_0 = arith.constant 0 : i32
    %c0_i32_1 = arith.constant 0 : i32
    return %arg0, %c0_i32, %c0_i32_0 : i32, i32, i32
  }
}

</mosaic_0001>

<bundles_post_ra>
// kernel: tpu_custom_call.1
= control target key start
LH: loop header
LB: loop body
LE: loop exit
PB: predicated region body
PF: predicated region fallthrough
CT: control target
= control target key end

     0   :  { %7 = vsyncpa [#allocation7], 0  ;;  %s1083_s0 = inlined_call_operand.hbm [shape: f32[18], index: 0, kind: input, shape index: {}]   ;;  %s1084_s1 = inlined_call_operand.hbm [shape: f32[2,4,256], index: 1, kind: input, shape index: {}]   ;;  %s1085_s2 = inlined_call_operand.hbm [shape: f32[2,4,256], index: 2, kind: output, shape index: {}]  }
   0x1   :  { %8 = vsyncpa [#allocation5], 0 }
   0x2   :  { %10 = vsyncpa [#allocation5 + $0x1], 0 }
   0x3   :  { %11 = vsyncpa [#allocation6], 0 }
   0x4   :  { %13 = vsyncpa [#allocation6 + $0x1], 0  ;;  %s876_s9 = smov 0   ;;  %s878_s10 = smov 0  }
   0x5   :  { %s880_s11 = smov 0   ;;  %s882_s12 = smov 0  }
   0x6 LB: > { %s897_s13 = sadd.s32 4294967295, %s850_s12   ;;  %s627_s14 = sadd.s32 4294967294, %s850_s12   ;;  %s850_s12 = sphi %s882_s12, %s1097_s12   ;;  %s846_s11 = sphi %s880_s11, %s1096_s11   ;;  %s842_s10 = sphi %s878_s10, %s1095_s10   ;;  %s838_s9 = sphi %s876_s9, %s1094_s9  }
   0x7   : > { %p60_p0 = scmp.ne.s32.totalorder %s842_s10, %s838_s9  ;;  %p61_p1 = scmp.eq.s32.totalorder %s897_s13, 0 }
   0x8   : > { %p84_p2 = scmp.eq.s32.totalorder %s897_s13, 1  ;;  %p90_p3 = scmp.eq.s32.totalorder %s627_s14, 1 }
   0x9   : > { %p906_p4 = por %p61_p1, %p60_p0  ;;  %p628_p5 = scmp.ge.s32.totalorder %s850_s12, 1 }
   0xa   : > { %p911_p6 = por %p90_p3, %p60_p0  ;;  %p97_p7 = scmp.lt.s32.totalorder %s850_s12, 3 }
   0xb   : > { %s109_s19 = sshll.u32 %s1083_s0, 4  ;;  %s927_s21 = sadd.s32 1, %s850_s12   ;;  %s110_s19 = int_to_ptr.hbm [resolvable:$true] %s109_s19 }
   0xc   : > { %p919_p8 = pnand %p628_p5, %p97_p7  ;;  %s44_s22 = ssub.s32 %s850_s12, %s927_s21 }
   0xd   : > { %p45_p12 = scmp.eq.s32.totalorder %s44_s22, 0  ;;  %s47_s23 = sadd.s32 1, %s846_s11 }
   0xe   : > { %p674_p10 = pneg %p919_p8  ;;  %p54_p13 = scmp.ne.s32.totalorder %s846_s11, %s842_s10 }
   0xf   : > { %s852_s24 = smov [#allocation4]   ;;  %p55_p0 = scmp.eq.s32.totalorder %s850_s12, 0 }
  0x10   : > { %p675_p11 = pnand %p674_p10, %p61_p1  ;;  %p942_p3 = por %p84_p2, %p54_p13 }
  0x11   : > { %s937_s25 = scalar_select %p45_p12, %s846_s11, %s47_s23  }
  0x12   : > { %677 = dma.hbm_to_smem (!%p675_p11), %s110_s19, 16, %s852_s24, [#allocation7]  }
  0x13   : > { %s120_s27 = sand.u32 1, %s846_s11   ;;  %p56_p5 = por %p55_p0, %p54_p13 }
  0x14   : > { %p687_p7 = scmp.lt.s32.totalorder %s850_s12, 2  ;;  %s631_s28 = sshll.u32 %s120_s27, 3 }
  0x15   : > { %s664_s29 = sshll.u32 %s850_s12, 3  ;;  %s124_s6 = scalar_lea.vmem [#allocation8], %s631_s28 }
  0x16   : > { %s129_s4 = scalar_lea.hbm %s1084_s1, %s664_s29  ;;  %s133_s7 = sshll.u32 %s124_s6, 4  ;;  %s134_s7 = int_to_ptr.vmem [resolvable:$true] %s133_s7 }
  0x17   : > { %s131_s5 = sshll.u32 %s129_s4, 4  ;;  %p952_p10 = pnand %p687_p7, %p56_p5  ;;  %s132_s5 = int_to_ptr.hbm [resolvable:$true] %s131_s5 }
  0x18   : > { %s121_s14 = scalar_lea.sflag [#allocation5], %s120_s27  ;;  %s750_s17 = sshra.s32 %s132_s5, 4  ;;  %s751_s17 = int_to_ptr.hbm [resolvable:$true] %s750_s17 }
  0x19   : > { %s752_s18 = scalar_lea.hbm %s751_s17, 8  ;;  %p754_p11 = pneg %p952_p10 }
  0x1a   : > { %p753_p2 = scmp.ne.s32.totalorder %s751_s17, %s752_s18  ;;  %s757_s23 = scalar_lea.hbm %s1084_s1, 16 }
  0x1b   : > { %p758_p0 = scmp.lt.s32.totalorder %s751_s17, %s1084_s1  ;;  %p759_p5 = scmp.lt.s32.totalorder %s757_s23, %s752_s18 }
  0x1c   : > { %p755_p12 = pnand %p754_p11, %p753_p2 }
  0x1d   : > { %p760_p7 = por %p759_p5, %p758_p0 }
  0x1e   : > { %p756_p13 = pneg %p755_p12 }
  0x20   : > { %p761_p9 = pnand %p760_p7, %p756_p13 }
  0x22   : > { %764 = shalt.err (!%p761_p9)
}
  0x23   : > { %681 = dma.hbm_to_vmem [thread:$0]  (!%p952_p10), %s132_s5, 128, %s134_s7, %s121_s14  }
  0x24   : > { %142 = sbr.rel (%p919_p8) target bundleno = 506 (0x1fa), region = 28 }
  0x29   : > { %825 = dma.done.wait (%p61_p1), [#allocation7], 16  }
  0x2a   : > { %827 = vsyncadd (%p61_p1), [#allocation7], 4294967280  ;;  %s973_s27 = sand.u32 1, %s842_s10  }
  0x2b   : > { %s636_s29 = sshll.u32 %s973_s27, 3  ;;  %s150_s30 = scalar_lea.sflag [#allocation5], %s973_s27 }
  0x2c   : > { %s153_s3 = scalar_lea.vmem [#allocation8], %s636_s29 }
  0x2d   : > { %829 = dma.done.wait (%p906_p4), %s150_s30, 128  }
  0x2e   : > { %831 = vsyncadd (%p906_p4), %s150_s30, 4294967168 }
  0x2f   : > { %159 = sfence }
  0x30   : > { %v176_v0 = vld [vmem:[%s153_s3] sm:$0xff]  ;;  %v219_v1 = vlaneseq  ;;  %v853_v2 = vmov 0.0   ;;  %vm183_vm1 = vcmask 1043456   ;;  %s643_s15 = sld [smem:[#allocation4 + $0x3]]  ;;  %vm230_vm2 = vcmask 1040384   ;;  %s854_s8 = smov 112  }
  0x31   : > { %178 = vst [vmem:[#allocation1] ss:$2 sm:$0xff] %v176_v0  ;;  %s647_s20 = sld [smem:[#allocation4 + $0x5]]  ;;  %s855_s17 = smov 96   ;;  %vm275_vm8 = vcmask 916480   ;;  %vm340_vm9 = vcmask 785408  }
  0x32   : > { %vm221_vm0 = vcmp.lt.s32.totalorder %v219_v1, 128  ;;  %vm991_vm3 = vcmp.lt.s32.totalorder %v219_v1, 256  ;;  %s649_s4 = sld [smem:[#allocation4 + $0x6]]  ;;  %v395_v42 = vand.u32 127, %v219_v1  ;;  %s856_s23 = smov 111   ;;  %vm440_vm10 = vcmask 908288  }
  0x33   : > { %223 = vst.msk [vmem:[#allocation2] sm:$0x1] %vm221_vm0, %v853_v2  ;;  %s653_s5 = sld [smem:[#allocation4 + $0x8]]  ;;  %s857_s24 = smov 113   ;;  %vm459_vm11 = vcmask 924672   ;;  %vm448_vm12 = vcmask 7168  }
  0x34   : > { %224 = vst.msk [vmem:[#allocation2 + $0x3] sm:$0x1] %vm221_vm0, %v853_v2  ;;  %s648_s6 = sld [smem:[#allocation4 + $0xe]]  ;;  %v396_v51 = vadd.s32 128, %v395_v42  ;;  %v401_v58 = vand.u32 15, %v395_v42  ;;  %vm467_vm13 = vcmask 1039360  }
  0x35   : > { %225 = vst.msk [vmem:[#allocation3] sm:$0x1] %vm221_vm0, %v853_v2  ;;  %s650_s7 = sld [smem:[#allocation4 + $0xf]] }
  0x36   : > { %226 = vst.msk [vmem:[#allocation3 + $0x3] sm:$0x1] %vm221_vm0, %v853_v2  ;;  %v269_v38 = vstv %s643_s15  ;;  %s644_s14 = sld [smem:[#allocation4 + $0xc]]  ;;  %v408_v53 = vand.u32 15, %v396_v51  ;;  %vm421_vm5 = vcmp.ne.s32.totalorder %v401_v58, 0  ;;  %vm427_vm7 = vcmp.ne.s32.totalorder %v401_v58, 15 }
  0x37   : > { %v313_v39 = vstv %s647_s20  ;;  %s654_s18 = sld [smem:[#allocation4 + $0x11]] }
  0x38   : > { %v179_v3 = vld.sshfl [vmem:[#allocation1] sm:$0xff pattern:$0x75316420]  ;;  %v180_v4 = vld.sshfl [vmem:[#allocation1 + $0x8] sm:$0xff pattern:$0x75316420]  ;;  %v334_v43 = vstv %s649_s4 }
  0x39   : > { %v184_v5 = vsel %vm183_vm1, %v179_v3, -inf  ;;  %v191_v6 = vsel %vm183_vm1, %v180_v4, -inf  ;;  %198 = vst [vmem:[#allocation1] ss:$2 sm:$0xff] %v176_v0  ;;  %v375_v52 = vstv %s653_s5  ;;  %vm422_vm4 = vcmp.ne.s32.totalorder %v408_v53, 0  ;;  %s645_s19 = sld [smem:[#allocation4 + $0x4]] }
  0x3a   : > { %v185_v7 = vrot.slane %v184_v5, 4  ;;  %v192_v8 = vrot.slane %v191_v6, 4  ;;  %v324_v55 = vstv %s648_s6  ;;  %v656_v61 = vsel %vm422_vm4, 1.0, %v853_v2  ;;  %s651_s22 = sld [smem:[#allocation4 + $0x7]]  ;;  %s858_s5 = smov 1  }
  0x3b   : > { %v345_v56 = vstv %s650_s7  ;;  %vm428_vm6 = vcmp.ne.s32.totalorder %v408_v53, 15  ;;  %v435_v1 = vrot.slane %v656_v61, 7  ;;  %v655_v4 = vsel %vm421_vm5, 1.0, %v853_v2  ;;  %s652_s28 = sld [smem:[#allocation4 + $0x10]]  ;;  %s859_s6 = smov 127  }
  0x3c   : > { %v186_v9 = vmax.f32 %v184_v5, %v185_v7  ;;  %v193_v10 = vmax.f32 %v191_v6, %v192_v8  ;;  %v280_v63 = vstv %s644_s14  ;;  %v658_v6 = vsel %vm428_vm6, 1.0, %v853_v2  ;;  %s646_s30 = sld [smem:[#allocation4 + $0xd]] }
  0x3d   : > { %v436_v7 = vsel %vm230_vm2, %v655_v4, %v435_v1  ;;  %v454_v8 = vrot.slane %v658_v6, 7  ;;  %s242_s3 = sld [smem:[#allocation4]] }
  0x3e   : > { %v187_v11 = vrot.slane %v186_v9, 2  ;;  %v194_v12 = vrot.slane %v193_v10, 2  ;;  %s638_s15 = sld [smem:[#allocation4 + $0x9]] }
  0x3f   : > { %s641_s20 = sld [smem:[#allocation4 + $0x2]] }
  0x40   : > { %v188_v13 = vmax.f32 %v186_v9, %v187_v11  ;;  %v195_v14 = vmax.f32 %v193_v10, %v194_v12  ;;  %v199_v15 = vld.sshfl [vmem:[#allocation1] sm:$0xff pattern:$0x75316420]  ;;  %v200_v16 = vld.sshfl [vmem:[#allocation1 + $0x8] sm:$0xff pattern:$0x75316420]  ;;  %v291_v11 = vstv %s645_s19 }
  0x41   : > { %v203_v17 = vsel %vm183_vm1, %v199_v15, 0.0  ;;  %v210_v18 = vsel %vm183_vm1, %v200_v16, 0.0  ;;  %498 = vst [vmem:[#allocation1] ss:$2 sm:$0xff] %v176_v0  ;;  %v385_v0 = vstv %s654_s18  ;;  %v657_v9 = vsel %vm427_vm7, 1.0, %v853_v2  ;;  %s642_s4 = sld [smem:[#allocation4 + $0xb]] }
  0x42   : > { %v189_v19 = vrot.slane %v188_v13, 1  ;;  %v196_v20 = vrot.slane %v195_v14, 1  ;;  %v204_v21 = vrot.slane %v203_v17, 4  ;;  %v211_v22 = vrot.slane %v210_v18, 4  ;;  %s639_s7 = sld [smem:[#allocation4 + $0x1]] }
  0x43   : > { %v455_v12 = vsel %vm230_vm2, %v657_v9, %v454_v8  ;;  %v365_v16 = vstv %s652_s28  ;;  %s640_s14 = sld [smem:[#allocation4 + $0xa]] }
  0x44   : > { %v190_v23 = vmax.f32 %v188_v13, %v189_v19  ;;  %v197_v24 = vmax.f32 %v195_v14, %v196_v20  ;;  %v205_v25 = vadd.f32 %v204_v21, %v203_v17  ;;  %v212_v26 = vadd.f32 %v211_v22, %v210_v18 }
  0x45   : > { %v355_v14 = vstv %s651_s22  ;;  %v302_v18 = vstv %s646_s30 }
  0x46   : > { %v206_v27 = vrot.slane %v205_v25, 2  ;;  %v213_v28 = vrot.slane %v212_v26, 2  ;;  %v229_v29 = vrot.slane %v197_v24, 7 }
  0x48   : > { %v207_v31 = vadd.f32 %v206_v27, %v205_v25  ;;  %v214_v32 = vadd.f32 %v213_v28, %v212_v26  ;;  %v231_v33 = vsel %vm230_vm2, %v190_v23, %v229_v29  ;;  %v499_v21 = vld.sshfl [vmem:[#allocation1] sm:$0xff pattern:$0x75316420]  ;;  %v244_v25 = vstv %s242_s3 }
  0x49   : > { %235 = vst.msk [vmem:[#allocation2 + $0x1] sm:$0x3] %vm991_vm3, %v231_v33  ;;  %v249_v26 = vstv %s638_s15  ;;  %v261_v27 = vstv %s641_s20  ;;  %v265_v28 = vstv %s642_s4  ;;  %s800_s20 = scalar_lea.hbm %s1085_s2, 16 }
  0x4a   : > { %v208_v34 = vrot.slane %v207_v31, 1  ;;  %v215_v35 = vrot.slane %v214_v32, 1 }
  0x4c   : > { %v209_v36 = vadd.f32 %v208_v34, %v207_v31  ;;  %v216_v37 = vadd.f32 %v215_v35, %v214_v32 }
  0x4e   : > { %v217_v40 = vmul.f32 0.25, %v209_v36  ;;  %v218_v41 = vmul.f32 0.25, %v216_v37 }
  0x50   : > { %v238_v44 = vrot.slane %v218_v41, 7  ;;  %v998_v45 = vld [vmem:[#allocation2] sm:$0x7] }
  0x51   : > { %v312_v46 = vld [vmem:[#allocation2 + $0x1] sm:$0x7]  ;;  %v270_v47 = vmul.f32 %v269_v38, %v998_v45  ;;  %v245_v31 = vmul.f32 %v244_v25, %v998_v45  ;;  %v262_v33 = vmul.f32 %v261_v27, %v998_v45 }
  0x52   : > { %v314_v48 = vmul.f32 %v313_v39, %v312_v46  ;;  %v335_v49 = vmul.f32 %v334_v43, %v312_v46  ;;  %v239_v50 = vsel %vm230_vm2, %v217_v40, %v238_v44  ;;  %v376_v54 = vmul.f32 %v375_v52, %v312_v46  ;;  %v290_v10 = vld [vmem:[#allocation2 + $0x1] sm:$0x3] }
  0x53   : > { %241 = vst.msk [vmem:[#allocation3 + $0x1] sm:$0x3] %vm991_vm3, %v239_v50  ;;  %272 = vrot.lane.b32.xlu0 %v270_v47, %s854_s8  ;;  %v292_v13 = vmul.f32 %v291_v11, %v290_v10  ;;  %v356_v15 = vmul.f32 %v355_v14, %v312_v46  ;;  %v500_v10 = vld.sshfl [vmem:[#allocation1 + $0x8] sm:$0xff pattern:$0x75316420]  ;;  %v253_v11 = vstv %s639_s7  ;;  %vm524_vm3 = vcmask 130048  }
  0x54   : > { %316 = vrot.lane.b32.xlu1 %v314_v48, %s854_s8  ;;  %337 = vrot.lane.b32.xlu2 %v335_v49, %s855_s17 }
  0x5a   : > { %v323_v57 = vld [vmem:[#allocation3 + $0x1] sm:$0x7] }
  0x5b   : > { %378 = vrot.lane.b32.xlu0 %v376_v54, %s855_s17  ;;  %v325_v59 = vmul.f32 %v324_v55, %v323_v57  ;;  %v346_v60 = vmul.f32 %v345_v56, %v323_v57  ;;  %v1009_v62 = vld [vmem:[#allocation3] sm:$0x7]  ;;  %v386_v5 = vmul.f32 %v385_v0, %v323_v57  ;;  %v366_v17 = vmul.f32 %v365_v16, %v323_v57 }
  0x5c   : > { %v281_v3 = vmul.f32 %v280_v63, %v1009_v62  ;;  %v301_v2 = vld [vmem:[#allocation3 + $0x1] sm:$0x3]  ;;  %v250_v30 = vmul.f32 %v249_v26, %v1009_v62  ;;  %v266_v32 = vmul.f32 %v265_v28, %v1009_v62 }
  0x5d   : > { %327 = vrot.lane.b32.xlu1 %v325_v59, %s854_s8  ;;  %348 = vrot.lane.b32.xlu2 %v346_v60, %s855_s17  ;;  %v303_v19 = vmul.f32 %v302_v18, %v301_v2 }
  0x5e   : > { %v251_v38 = vadd.f32 %v250_v30, %v245_v31  ;;  %v267_v39 = vadd.f32 %v266_v32, %v262_v33 }
  0x63   : > { %283 = vrot.lane.b32.xlu0 %v281_v3, %s854_s8 }
  0x65   : > { %388 = vrot.lane.b32.xlu1 %v386_v5, %s855_s17  ;;  %437 = vrot.lane.b32.xlu2 %v436_v7, %s856_s23  ;;  %s175_s23 = scalar_lea.vmem [#allocation9], %s636_s29 }
  0x6b   : > { %456 = vrot.lane.b32.xlu0 %v455_v12, %s857_s24  ;;  %v257_v12 = vstv %s640_s14  ;;  %s542_s24 = sshll.u32 %s175_s23, 4  ;;  %s543_s24 = int_to_ptr.vmem [resolvable:$true] %s542_s24 }
  0x6d   : > { %294 = vrot.lane.b32.xlu1 %v292_v13, %s854_s8  ;;  %305 = vrot.lane.b32.xlu2 %v303_v19, %s854_s8  ;;  %v258_v13 = vmul.f32 %v257_v12, %v1009_v62 }
  0x73   : > { %358 = vrot.lane.b32.xlu0 %v356_v15, %s855_s17  ;;  %v254_v15 = vmul.f32 %v253_v11, %v998_v45 }
  0x75   : > { %368 = vrot.lane.b32.xlu1 %v366_v17, %s855_s17  ;;  %v259_v17 = vadd.f32 %v258_v13, %v254_v15  ;;  %s665_s17 = sshll.u32 %s897_s13, 3  ;;  %s529_s13 = scalar_lea.sflag [#allocation6], %s973_s27 }
  0x76   : > { %s540_s22 = scalar_lea.hbm %s1085_s2, %s665_s17 }
  0x77   : > { %s544_s28 = sshll.u32 %s540_s22, 4  ;;  %s545_s28 = int_to_ptr.hbm [resolvable:$true] %s544_s28 }
  0x78   : > { %s794_s30 = sshra.s32 %s545_s28, 4  ;;  %s795_s30 = int_to_ptr.hbm [resolvable:$true] %s794_s30 }
  0x79   : > { %s796_s3 = scalar_lea.hbm %s795_s30, 8  ;;  %p801_p9 = scmp.lt.s32.totalorder %s795_s30, %s1085_s2 }
  0x7a   : > { %p797_p1 = scmp.ne.s32.totalorder %s795_s30, %s796_s3  ;;  %p802_p10 = scmp.lt.s32.totalorder %s800_s20, %s796_s3 }
  0x7c   : > { %p798_p4 = pnand %p797_p1, %p942_p3  ;;  %p803_p2 = por %p802_p10, %p801_p9 }
  0x7d   : > { %501 = vrot.lane.b32.xlu1 %v499_v21, %s854_s8 }
  0x7e   : > { %p799_p8 = pneg %p798_p4 }
  0x80   : > { %p804_p11 = pnand %p803_p2, %p799_p8 }
  0xae   : > { %v338_v20 = vpop.permute.xlu2 %337 }
  0xaf   : > { %v339_v40 = vrot.slane %v338_v20, 7 }
  0xb1   : > { %v341_v51 = vsel %vm340_vm9, %v339_v40, %v338_v20 }
  0xb7   : > { %v349_v24 = vpop.permute.xlu2 %348 }
  0xb8   : > { %v350_v47 = vrot.slane %v349_v24, 7 }
  0xba   : > { %v351_v59 = vsel %vm340_vm9, %v350_v47, %v349_v24 }
  0xbf   : > { %v438_v44 = vpop.permute.xlu2 %437 }
  0xc0   : > { %v439_v56 = vrot.slane %v438_v44, 7 }
  0xc2   : > { %v441_v0 = vsel %vm440_vm10, %v439_v56, %v438_v44 }
  0xc5   : > { %v273_v22 = vpop.permute.xlu0 %272 }
  0xc6   : > { %v317_v23 = vpop.permute.xlu1 %316  ;;  %v274_v35 = vrot.slane %v273_v22, 1 }
  0xc7   : > { %v318_v36 = vrot.slane %v317_v23, 7  ;;  %v306_v2 = vpop.permute.xlu2 %305 }
  0xc8   : > { %v276_v41 = vsel %vm275_vm8, %v273_v22, %v274_v35  ;;  %v307_v19 = vrot.slane %v306_v2, 7 }
  0xc9   : > { %v319_v42 = vsel %vm275_vm8, %v318_v36, %v317_v23  ;;  %v278_v49 = vadd.f32 %v276_v41, %v251_v38 }
  0xca   : > { %v321_v50 = vadd.f32 %v319_v42, %v267_v39  ;;  %v308_v22 = vsel %vm275_vm8, %v307_v19, %v306_v2 }
  0xcd   : > { %v379_v29 = vpop.permute.xlu0 %378 }
  0xce   : > { %v380_v53 = vrot.slane %v379_v29, 7 }
  0xcf   : > { %v328_v34 = vpop.permute.xlu1 %327 }
  0xd0   : > { %v329_v37 = vrot.slane %v328_v34, 7  ;;  %v381_v61 = vsel %vm340_vm9, %v380_v53, %v379_v29 }
  0xd2   : > { %v330_v46 = vsel %vm275_vm8, %v329_v37, %v328_v34 }
  0xd3   : > { %v332_v57 = vadd.f32 %v330_v46, %v321_v50 }
  0xd5   : > { %v284_v43 = vpop.permute.xlu0 %283  ;;  %v383_v1 = vadd.f32 %v381_v61, %v332_v57 }
  0xd6   : > { %v285_v48 = vrot.slane %v284_v43, 1 }
  0xd7   : > { %v389_v52 = vpop.permute.xlu1 %388 }
  0xd8   : > { %v286_v54 = vsel %vm275_vm8, %v284_v43, %v285_v48  ;;  %v390_v55 = vrot.slane %v389_v52, 7 }
  0xd9   : > { %v288_v58 = vadd.f32 %v286_v54, %v278_v49 }
  0xda   : > { %v391_v63 = vsel %vm340_vm9, %v390_v55, %v389_v52 }
  0xdb   : > { %v343_v60 = vadd.f32 %v341_v51, %v288_v58  ;;  %v393_v6 = vadd.f32 %v391_v63, %v383_v1 }
  0xdd   : > { %v353_v3 = vadd.f32 %v351_v59, %v343_v60  ;;  %v457_v4 = vpop.permute.xlu0 %456 }
  0xde   : > { %v458_v5 = vrot.slane %v457_v4, 7 }
  0xdf   : > { %v443_v7 = vmul.f32 %v441_v0, %v353_v3  ;;  %v295_v14 = vpop.permute.xlu1 %294 }
  0xe0   : > { %v460_v8 = vsel %vm459_vm11, %v458_v5, %v457_v4  ;;  %v296_v16 = vrot.slane %v295_v14, 7 }
  0xe1   : > { %v462_v9 = vmul.f32 %v460_v8, %v393_v6  ;;  %445 = vrot.lane.b32.xlu2 %v443_v7, %s858_s5 }
  0xe2   : > { %v297_v18 = vsel %vm275_vm8, %v296_v16, %v295_v14 }
  0xe3   : > { %464 = vrot.lane.b32.xlu0 %v462_v9, %s859_s6  ;;  %v299_v21 = vadd.f32 %v297_v18, %v259_v17 }
  0xe5   : > { %v359_v20 = vpop.permute.xlu0 %358  ;;  %v310_v25 = vadd.f32 %v308_v22, %v299_v21 }
  0xe6   : > { %v360_v23 = vrot.slane %v359_v20, 7 }
  0xe7   : > { %v369_v24 = vpop.permute.xlu1 %368 }
  0xe8   : > { %v361_v26 = vsel %vm340_vm9, %v360_v23, %v359_v20  ;;  %v370_v27 = vrot.slane %v369_v24, 7 }
  0xe9   : > { %503 = vrot.lane.b32.xlu2 %v500_v10, %s854_s8  ;;  %v363_v28 = vadd.f32 %v361_v26, %v310_v25  ;;  %s860_s8 = smov 16  }
  0xea   : > { %v371_v45 = vsel %vm340_vm9, %v370_v27, %v369_v24 }
  0xeb   : > { %v373_v30 = vadd.f32 %v371_v45, %v363_v28 }
  0xef   : > { %v502_v48 = vpop.permute.xlu1 %501 }
 0x13b   : > { %v446_v62 = vpop.permute.xlu2 %445 }
 0x13c   : > { %v447_v29 = vrot.slane %v446_v62, 7 }
 0x13e   : > { %v449_v31 = vsel %vm448_vm12, %v447_v29, %v446_v62 }
 0x13f   : > { %v451_v34 = vadd.f32 %v449_v31, %v373_v30 }
 0x143   : > { %v504_v50 = vpop.permute.xlu2 %503 }
 0x144   : > { %v505_v54 = vsel %vm275_vm8, %v502_v48, %v504_v50 }
 0x155   : > { %v465_v32 = vpop.permute.xlu0 %464 }
 0x156   : > { %v466_v33 = vrot.slane %v465_v32, 1 }
 0x158   : > { %v468_v35 = vsel %vm467_vm13, %v465_v32, %v466_v33 }
 0x159   : > { %v470_v36 = vadd.f32 %v468_v35, %v451_v34 }
 0x15b   : > { %v471_v37 = vsub.f32 0.0, %v470_v36 }
 0x15d   : > { %v472_v38 = vmul.f32 1.442695, %v471_v37 }
 0x15f   : > { %731 = vpow2.f32 %v472_v38 }
 0x165   : > { %v732_v39 = vpop.eup %731 }
 0x166   : > { %v474_v40 = vadd.f32 1.0, %v732_v39 }
 0x168   : > { %733 = vrcp.f32 %v474_v40  ;;  %v486_v44 = vand.u32 2147483648, %v474_v40  ;;  %v484_v47 = vand.u32 2147483647, %v474_v40  ;;  %vm480_vm15 = vweird.f32 %v474_v40 }
 0x16a   : > { %v487_v51 = vor.u32 1.1754944e-38, %v486_v44  ;;  %vm485_vm2 = vcmp.eq.f32.partialorder %v484_v47, 8.507059e+37 }
 0x16e   : > { %v734_v41 = vpop.eup %733 }
 0x16f   : > { %v476_v42 = vmul.f32 %v734_v41, %v474_v40  ;;  %vm481_vm14 = vweird.f32 %v734_v41 }
 0x170   : > { %vm482_vm0 = vmor %vm480_vm15, %vm481_vm14 }
 0x171   : > { %v477_v43 = vsub.f32 1.0, %v476_v42 }
 0x173   : > { %v478_v46 = vmul.f32 %v734_v41, %v477_v43 }
 0x175   : > { %v479_v49 = vadd.f32 %v734_v41, %v478_v46 }
 0x177   : > { %v483_v52 = vsel %vm482_vm0, %v734_v41, %v479_v49 }
 0x178   : > { %v488_v53 = vsel %vm485_vm2, %v487_v51, %v483_v52 }
 0x179   : > { %v491_v55 = vperm.slane %v488_v53, 0  ;;  %v492_v56 = vperm.slane %v488_v53, 1  ;;  %v493_v57 = vperm.slane %v488_v53, 2 }
 0x17b   : > { %v510_v58 = vmul.f32 %v505_v54, %v492_v56  ;;  %v511_v59 = vmul.f32 %v504_v50, %v493_v57  ;;  %v509_v60 = vmul.f32 %v502_v48, %v491_v55 }
 0x17d   : > { %v515_v61 = vrot.slane %v510_v58, 4  ;;  %519 = vrot.lane.b32.xlu1 %v511_v59, %s860_s8 }
 0x17f   : > { %v516_v63 = vsel %vm183_vm1, %v509_v60, %v515_v61 }
 0x180   : > { %517 = vrot.lane.b32.xlu0 %v516_v63, %s860_s8 }
 0x1ef   : > { %v520_v0 = vpop.permute.xlu1 %519 }
 0x1f0   : > { %v522_v3 = vrot.slane %v520_v0, 4 }
 0x1f2   : > { %v518_v1 = vpop.permute.xlu0 %517 }
 0x1f3   : > { %v521_v4 = vrot.slane %v518_v1, 4 }
 0x1f5   : > { %v523_v5 = vsel %vm183_vm1, %v521_v4, %v522_v3 }
 0x1f6   : > { %v525_v6 = vsel %vm524_vm3, %v518_v1, %v523_v5 }
 0x1f7   : > { %527 = vst [vmem:[%s175_s23] sm:$0xff] %v525_v6 }
 0x1f8   : > { %807 = shalt.err (!%p804_p11)
}
 0x1f9   : > { %672 = dma.vmem_to_hbm [thread:$0]  (%p942_p3), %s543_s24, 128, %s545_s28, %s529_s13  }
 0x1fa PF: > { %s556_s27 = sand.u32 1, %s838_s9   ;;  %p1093_p12 = scmp.ge.s32.totalorder %s850_s12, 2 }
 0x1fb   : > { %s557_s6 = scalar_lea.sflag [#allocation6], %s556_s27 }
 0x1fc   : > { %p683_p13 = pnand %p1093_p12, %p911_p6 }
 0x1fe   : > { %p684_p0 = pneg %p683_p13 }
 0x200   : > { %833 = dma.done.wait (%p684_p0), %s557_s6, 128  }
 0x201   : > { %835 = vsyncadd (%p684_p0), %s557_s6, 4294967168  ;;  %p16_p5 = scmp.ge.s32.totalorder %s927_s21, 4   ;;  %s1094_s9 = smov %s842_s10 }
 0x202   : > { %s1095_s10 = smov %s846_s11  ;;  %s1096_s11 = smov %s937_s25 }
 0x203   : > { %s1097_s12 = smov %s927_s21  ;;  %18 = sbr.rel (!%p16_p5) target bundleno = 6 (0x6), region = 78 }
 0x208   :  { %563 = vsyncpa [#allocation5], 1 }
 0x209   :  { %565 = vsyncpa [#allocation5 + $0x1], 1 }
 0x20a   :  { %566 = vsyncpa [#allocation6], 1 }
 0x20b   :  { %568 = vsyncpa [#allocation6 + $0x1], 1 }
 0x20c   :  { %569 = vsyncpa [#allocation7], 1 }
 0x20d   :  { %571 = vsyncpa [#allocation7 + $0x1], 1 }

</bundles_post_ra>
